<compile_context>
chip_gen: v7x
topology: tpu7x:2x2x1
jax: 0.10.0
libtpu: 0.0.40
codegen_flags: <defaults>
</compile_context>

<pallas_src>
import jax
import jax.numpy as jnp
from jax.experimental import pallas as pl
from jax.experimental.pallas import tpu as pltpu

# forward() only consumes sigmoid(diff)[:, 0] * sigmoid(diff)[:, 1].
_NUM_OUT = 2


def _diff_aat_kernel(scal_ref, ext_ref, eyt_ref, w_ref, dsel_ref, o_ref):
    """One batch tile of the DiffAATProbe forward (output dims 0 and 1 only).

    scal_ref : SMEM (2,) f32   [epsilon, sigmoid_width]
    ext_ref  : VMEM (H, TB)    Ex tile, transposed (batch on lanes)
    eyt_ref  : VMEM (H, TB)    Ey tile, transposed
    w_ref    : VMEM (2, H)     rows 0..1 of the linear weight (torch layout)
    dsel_ref : VMEM (2*H, H)   dsel[k*H + j, i] = D_norm[i, j, k],  k in {0,1}
    o_ref    : VMEM (1, TB)    p = sigmoid(diff/w)[:, 0] * sigmoid(diff/w)[:, 1]
    """
    eps = scal_ref[0]
    inv_width = 1.0 / jnp.maximum(scal_ref[1], 0.001)

    xt = ext_ref[...]                                   # [H, TB]
    yt = eyt_ref[...]                                   # [H, TB]
    h = xt.shape[0]
    dsel = dsel_ref[...]                                # [2H, H]

    # Linear term is affine -> compute once on the difference.           (MXU)
    lin = jnp.dot(w_ref[...], xt - yt,
                  preferred_element_type=jnp.float32)   # [2, TB]

    # Bilinear term: t[k*H + j, b] = sum_i D[i, j, k] * x[b, i].         (MXU)
    tx = jnp.dot(dsel, xt, preferred_element_type=jnp.float32)           # [2H, TB]
    ty = jnp.dot(dsel, yt, preferred_element_type=jnp.float32)           # [2H, TB]

    # quad_k[b] = sum_j x[b, j] * t[k*H + j, b]; take the x/y difference
    # before the reduction.  f32 scale on the VPU + sublane sum on the XLU.
    q0 = jnp.sum(xt * tx[0:h, :] - yt * ty[0:h, :], axis=0, keepdims=True)     # [1, TB]
    q1 = jnp.sum(xt * tx[h:2 * h, :] - yt * ty[h:2 * h, :], axis=0, keepdims=True)

    d0 = lin[0:1, :] + eps * q0
    d1 = lin[1:2, :] + eps * q1

    s0 = 1.0 / (1.0 + jnp.exp(-(d0 * inv_width)))       # EUP exp
    s1 = 1.0 / (1.0 + jnp.exp(-(d1 * inv_width)))
    o_ref[...] = (s0 * s1).astype(o_ref.dtype)


def _pick_batch_tile(batch):
    if batch <= 512:
        return batch
    for t in (512, 256, 128):
        if batch % t == 0:
            return t
    return batch  # single full block — always a legal BlockSpec


def prepare_probe_params(lin_w, d_param, n_power_iterations=5, seed=0):
    """Spectral-normalize D (as torch's parametrization does) and pre-slice
    the weights to the two embedding dims the forward output actually uses.

    Returns (w_sel, dsel, d_norm):
      w_sel  : [2, H]     rows 0..1 of the linear weight
      dsel   : [2*H, H]   dsel[k*H + j, i] = D_norm[i, j, k] for k in {0,1}
      d_norm : [H, H, E]  full spectral-normalized D (for the reference check)
    """
    hidden_dim, _, emb_dim = d_param.shape
    w2d = d_param.reshape(hidden_dim, -1)              # torch: weight.reshape(H, -1)

    u = jax.random.normal(jax.random.PRNGKey(seed), (hidden_dim,), jnp.float32)
    u = u / jnp.linalg.norm(u)

    def body(_, u):
        v = w2d.T @ u
        v = v / (jnp.linalg.norm(v) + 1e-12)
        u_new = w2d @ v
        return u_new / (jnp.linalg.norm(u_new) + 1e-12)

    u = jax.lax.fori_loop(0, n_power_iterations, body, u)
    v = w2d.T @ u
    v = v / (jnp.linalg.norm(v) + 1e-12)
    sigma = u @ (w2d @ v)
    d_norm = d_param / sigma

    # [E, H(j), H(i)] with element [k, j, i] = D[i, j, k]; keep k = 0, 1.
    dsel = jnp.transpose(d_norm, (2, 1, 0))[:_NUM_OUT].reshape(
        _NUM_OUT * hidden_dim, hidden_dim)
    w_sel = lin_w[:_NUM_OUT, :]
    return dsel.astype(jnp.float32), w_sel.astype(jnp.float32), d_norm


def diff_aat_probe_forward(ex, ey, w_sel, dsel, epsilon, sigmoid_width):
    """Equivalent of DiffAATProbe.forward(Ex, Ey) -> [B]."""
    batch, hidden_dim = ex.shape

    # Batch-on-lanes layout for the kernel (tiny relayout, fused under jit).
    ex_t = ex.T                                          # [H, B]
    ey_t = ey.T

    scal = jnp.stack([jnp.asarray(epsilon, jnp.float32),
                      jnp.asarray(sigmoid_width, jnp.float32)])

    tile_b = _pick_batch_tile(batch)
    num_tiles = pl.cdiv(batch, tile_b)

    cost = pl.CostEstimate(
        flops=int(2 * batch * (_NUM_OUT * hidden_dim                   # linear(dx)
                               + 2 * _NUM_OUT * hidden_dim * hidden_dim  # D contractions
                               + 2 * _NUM_OUT * hidden_dim)),            # scale+reduce
        transcendentals=int(_NUM_OUT * batch),
        bytes_accessed=int(4 * (2 * batch * hidden_dim
                                + _NUM_OUT * hidden_dim
                                + _NUM_OUT * hidden_dim * hidden_dim
                                + batch)),
    )

    out = pl.pallas_call(
        _diff_aat_kernel,
        out_shape=jax.ShapeDtypeStruct((1, batch), jnp.float32),
        grid=(num_tiles,),
        in_specs=[
            pl.BlockSpec(memory_space=pltpu.MemorySpace.SMEM),            # scalars
            pl.BlockSpec((hidden_dim, tile_b), lambda i: (0, i)),         # Ex.T
            pl.BlockSpec((hidden_dim, tile_b), lambda i: (0, i)),         # Ey.T
            pl.BlockSpec((_NUM_OUT, hidden_dim), lambda i: (0, 0)),       # W[0:2]   (resident)
            pl.BlockSpec((_NUM_OUT * hidden_dim, hidden_dim),
                         lambda i: (0, 0)),                               # D slabs  (resident)
        ],
        out_specs=pl.BlockSpec((1, tile_b), lambda i: (0, i)),
        compiler_params=pltpu.CompilerParams(
            dimension_semantics=("parallel",),
            vmem_limit_bytes=32 * 1024 * 1024,
        ),
        cost_estimate=cost,
    )(scal, ex_t, ey_t, w_sel, dsel)

    return out[0]


if __name__ == "__main__":
    key = jax.random.PRNGKey(0)
    k_w, k_d, k_x, k_y = jax.random.split(key, 4)

    batch = 8
    hidden_dim = 32
    emb_dim = 16
    epsilon = 0.1
    sigmoid_width = jnp.float32(1.0)

    # Parameters mirroring DiffAATProbe.__init__ (identity-structured init),
    # perturbed slightly so the numeric check exercises the full bilinear term.
    lin_w = (jnp.eye(emb_dim, hidden_dim, dtype=jnp.float32)
             + 0.05 * jax.random.normal(k_w, (emb_dim, hidden_dim), jnp.float32))
    d_param = (jnp.eye(hidden_dim, dtype=jnp.float32)[:, :, None]
               * jnp.ones((1, 1, emb_dim), jnp.float32)
               + 0.05 * jax.random.normal(k_d, (hidden_dim, hidden_dim, emb_dim),
                                          jnp.float32))

    ex = jax.random.normal(k_x, (batch, hidden_dim), jnp.float32)
    ey = jax.random.normal(k_y, (batch, hidden_dim), jnp.float32)

    dsel, w_sel, d_norm = prepare_probe_params(lin_w, d_param)

    fwd = jax.jit(lambda a, b: diff_aat_probe_forward(
        a, b, w_sel, dsel, epsilon, sigmoid_width))
    out = jax.block_until_ready(fwd(ex, ey))

    # Pure-JAX reference mirroring the torch forward exactly (the torch
    # `p = torch.mean(...)` line is dead code — it is immediately overwritten,
    # so the output depends only on embedding dims 0 and 1).
    hi = jax.lax.Precision.HIGHEST

    def ref_transform(z):
        lin = jnp.dot(z, lin_w.T, precision=hi)
        quad = jnp.einsum('bi,bj,ijk->bk', z, z, d_norm, precision=hi)
        return lin + epsilon * quad

    diff = ref_transform(ex) - ref_transform(ey)
    sig = jax.nn.sigmoid(diff / jnp.maximum(sigmoid_width, 0.001))
    ref = sig[:, 0] * sig[:, 1]

    assert out.shape == (batch,)
    # Tolerance accounts for the MXU's default (bf16-pass) operand rounding in
    # the kernel vs. the HIGHEST-precision reference; wiring bugs would be
    # orders of magnitude larger.
    assert jnp.allclose(out, ref, atol=2e-2, rtol=2e-2), (out, ref)
    print("KERNEL_OK")
</pallas_src>

<mosaic_0001>
module attributes {stable_mosaic.version = 11 : i64} {
  func.func @_diff_aat_kernel(%arg0: i32, %arg1: memref<2xf32, #tpu.memory_space<smem>>, %arg2: memref<32x8xf32, #tpu.memory_space<vmem>>, %arg3: memref<32x8xf32, #tpu.memory_space<vmem>>, %arg4: memref<2x32xf32, #tpu.memory_space<vmem>>, %arg5: memref<64x32xf32, #tpu.memory_space<vmem>>, %arg6: memref<1x8xf32, #tpu.memory_space<vmem>>) attributes {dimension_semantics = [#tpu.dimension_semantics<parallel>], iteration_bounds = array<i64: 1>, scalar_prefetch = 0 : i64, scratch_operands = 0 : i64, tpu.core_type = #tpu.core_type<tc>, window_params = [{transform_indices = @transform_0, window_bounds = array<i64: 2>}, {transform_indices = @transform_1, window_bounds = array<i64: 32, 8>}, {transform_indices = @transform_2, window_bounds = array<i64: 32, 8>}, {pipeline_mode = #tpu.pipeline_mode<synchronous>, transform_indices = @transform_3, window_bounds = array<i64: 2, 32>}, {pipeline_mode = #tpu.pipeline_mode<synchronous>, transform_indices = @transform_4, window_bounds = array<i64: 64, 32>}, {transform_indices = @transform_5, window_bounds = array<i64: 1, 8>}]} {
    %c0 = arith.constant 0 : index
    %0 = memref.load %arg1[%c0] : memref<2xf32, #tpu.memory_space<smem>>
    %c1 = arith.constant 1 : index
    %1 = memref.load %arg1[%c1] : memref<2xf32, #tpu.memory_space<smem>>
    %cst = arith.constant 1.000000e-03 : f32
    %2 = arith.maximumf %1, %cst : f32
    %cst_0 = arith.constant 1.000000e+00 : f32
    %3 = arith.divf %cst_0, %2 : f32
    %c0_1 = arith.constant 0 : index
    %c0_2 = arith.constant 0 : index
    %4 = vector.load %arg2[%c0_1, %c0_2] : memref<32x8xf32, #tpu.memory_space<vmem>>, vector<32x8xf32>
    %c0_3 = arith.constant 0 : index
    %c0_4 = arith.constant 0 : index
    %5 = vector.load %arg3[%c0_3, %c0_4] : memref<32x8xf32, #tpu.memory_space<vmem>>, vector<32x8xf32>
    %c0_5 = arith.constant 0 : index
    %c0_6 = arith.constant 0 : index
    %6 = vector.load %arg5[%c0_5, %c0_6] : memref<64x32xf32, #tpu.memory_space<vmem>>, vector<64x32xf32>
    %c0_7 = arith.constant 0 : index
    %c0_8 = arith.constant 0 : index
    %7 = vector.load %arg4[%c0_7, %c0_8] : memref<2x32xf32, #tpu.memory_space<vmem>>, vector<2x32xf32>
    %8 = arith.subf %4, %5 : vector<32x8xf32>
    %cst_9 = arith.constant dense<0.000000e+00> : vector<2x8xf32>
    %9 = tpu.matmul %7, %8, %cst_9 {dimension_numbers = #tpu.dot_dimension_numbers<[1], [0], [0], [1], [0, 0, 1, 1], [], []>} : vector<2x32xf32>, vector<32x8xf32>, vector<2x8xf32> -> vector<2x8xf32>
    %cst_10 = arith.constant dense<0.000000e+00> : vector<64x8xf32>
    %10 = tpu.matmul %6, %4, %cst_10 {dimension_numbers = #tpu.dot_dimension_numbers<[1], [0], [0], [1], [0, 0, 1, 1], [], []>} : vector<64x32xf32>, vector<32x8xf32>, vector<64x8xf32> -> vector<64x8xf32>
    %cst_11 = arith.constant dense<0.000000e+00> : vector<64x8xf32>
    %11 = tpu.matmul %6, %5, %cst_11 {dimension_numbers = #tpu.dot_dimension_numbers<[1], [0], [0], [1], [0, 0, 1, 1], [], []>} : vector<64x32xf32>, vector<32x8xf32>, vector<64x8xf32> -> vector<64x8xf32>
    %12 = vector.extract_strided_slice %10 {offsets = [0, 0], sizes = [32, 8], strides = [1, 1]} : vector<64x8xf32> to vector<32x8xf32>
    %13 = arith.mulf %4, %12 : vector<32x8xf32>
    %14 = vector.extract_strided_slice %11 {offsets = [0, 0], sizes = [32, 8], strides = [1, 1]} : vector<64x8xf32> to vector<32x8xf32>
    %15 = arith.mulf %5, %14 : vector<32x8xf32>
    %16 = arith.subf %13, %15 : vector<32x8xf32>
    %cst_12 = arith.constant dense<0.000000e+00> : vector<8xf32>
    %17 = vector.multi_reduction <add>, %16, %cst_12 [0] : vector<32x8xf32> to vector<8xf32>
    %18 = vector.shape_cast %17 : vector<8xf32> to vector<1x8xf32>
    %19 = vector.extract_strided_slice %10 {offsets = [32, 0], sizes = [32, 8], strides = [1, 1]} : vector<64x8xf32> to vector<32x8xf32>
    %20 = arith.mulf %4, %19 : vector<32x8xf32>
    %21 = vector.extract_strided_slice %11 {offsets = [32, 0], sizes = [32, 8], strides = [1, 1]} : vector<64x8xf32> to vector<32x8xf32>
    %22 = arith.mulf %5, %21 : vector<32x8xf32>
    %23 = arith.subf %20, %22 : vector<32x8xf32>
    %cst_13 = arith.constant dense<0.000000e+00> : vector<8xf32>
    %24 = vector.multi_reduction <add>, %23, %cst_13 [0] : vector<32x8xf32> to vector<8xf32>
    %25 = vector.shape_cast %24 : vector<8xf32> to vector<1x8xf32>
    %26 = vector.extract_strided_slice %9 {offsets = [0, 0], sizes = [1, 8], strides = [1, 1]} : vector<2x8xf32> to vector<1x8xf32>
    %27 = vector.broadcast %0 : f32 to vector<1x8xf32>
    %28 = arith.mulf %27, %18 : vector<1x8xf32>
    %29 = arith.addf %26, %28 : vector<1x8xf32>
    %30 = vector.extract_strided_slice %9 {offsets = [1, 0], sizes = [1, 8], strides = [1, 1]} : vector<2x8xf32> to vector<1x8xf32>
    %31 = vector.broadcast %0 : f32 to vector<1x8xf32>
    %32 = arith.mulf %31, %25 : vector<1x8xf32>
    %33 = arith.addf %30, %32 : vector<1x8xf32>
    %34 = vector.broadcast %3 : f32 to vector<1x8xf32>
    %35 = arith.mulf %29, %34 : vector<1x8xf32>
    %cst_14 = arith.constant 0.000000e+00 : f32
    %36 = vector.broadcast %cst_14 : f32 to vector<1x8xf32>
    %37 = arith.subf %36, %35 : vector<1x8xf32>
    %38 = math.exp %37 : vector<1x8xf32>
    %cst_15 = arith.constant 1.000000e+00 : f32
    %39 = vector.broadcast %cst_15 : f32 to vector<1x8xf32>
    %40 = arith.addf %39, %38 : vector<1x8xf32>
    %cst_16 = arith.constant 1.000000e+00 : f32
    %41 = vector.broadcast %cst_16 : f32 to vector<1x8xf32>
    %42 = arith.divf %41, %40 : vector<1x8xf32>
    %43 = vector.broadcast %3 : f32 to vector<1x8xf32>
    %44 = arith.mulf %33, %43 : vector<1x8xf32>
    %cst_17 = arith.constant 0.000000e+00 : f32
    %45 = vector.broadcast %cst_17 : f32 to vector<1x8xf32>
    %46 = arith.subf %45, %44 : vector<1x8xf32>
    %47 = math.exp %46 : vector<1x8xf32>
    %cst_18 = arith.constant 1.000000e+00 : f32
    %48 = vector.broadcast %cst_18 : f32 to vector<1x8xf32>
    %49 = arith.addf %48, %47 : vector<1x8xf32>
    %cst_19 = arith.constant 1.000000e+00 : f32
    %50 = vector.broadcast %cst_19 : f32 to vector<1x8xf32>
    %51 = arith.divf %50, %49 : vector<1x8xf32>
    %52 = arith.mulf %42, %51 : vector<1x8xf32>
    %c0_20 = arith.constant 0 : index
    %c0_21 = arith.constant 0 : index
    %53 = vector.load %arg6[%c0_20, %c0_21] : memref<1x8xf32, #tpu.memory_space<vmem>>, vector<1x8xf32>
    tpu.vector_store %arg6[%c0_20, %c0_21], %52 {strides = array<i32>} : memref<1x8xf32, #tpu.memory_space<vmem>>, vector<1x8xf32>,
    return
  }
  func.func @transform_0(%arg0: i32) -> i32 {
    %c0_i32 = arith.constant 0 : i32
    %c0_i32_0 = arith.constant 0 : i32
    return %c0_i32 : i32
  }
  func.func @transform_1(%arg0: i32) -> (i32, i32) {
    %c0_i32 = arith.constant 0 : i32
    %c0_i32_0 = arith.constant 0 : i32
    return %c0_i32, %arg0 : i32, i32
  }
  func.func @transform_2(%arg0: i32) -> (i32, i32) {
    %c0_i32 = arith.constant 0 : i32
    %c0_i32_0 = arith.constant 0 : i32
    return %c0_i32, %arg0 : i32, i32
  }
  func.func @transform_3(%arg0: i32) -> (i32, i32) {
    %c0_i32 = arith.constant 0 : i32
    %c0_i32_0 = arith.constant 0 : i32
    %c0_i32_1 = arith.constant 0 : i32
    return %c0_i32, %c0_i32_0 : i32, i32
  }
  func.func @transform_4(%arg0: i32) -> (i32, i32) {
    %c0_i32 = arith.constant 0 : i32
    %c0_i32_0 = arith.constant 0 : i32
    %c0_i32_1 = arith.constant 0 : i32
    return %c0_i32, %c0_i32_0 : i32, i32
  }
  func.func @transform_5(%arg0: i32) -> (i32, i32) {
    %c0_i32 = arith.constant 0 : i32
    %c0_i32_0 = arith.constant 0 : i32
    return %c0_i32, %arg0 : i32, i32
  }
}

</mosaic_0001>

<bundles_post_ra>
// kernel: _lambda_.1
= control target key start
LH: loop header
LB: loop body
LE: loop exit
PB: predicated region body
PF: predicated region fallthrough
CT: control target
= control target key end

     0   :  { %10 = vsyncpa [#allocation4], 0  ;;  %s820_s0 = inlined_call_operand.vmem [shape: f32[2], index: 0, kind: input, shape index: {}]   ;;  %s821_s1 = inlined_call_operand.vmem [shape: f32[32,8], index: 1, kind: input, shape index: {}]   ;;  %s822_s2 = inlined_call_operand.vmem [shape: f32[32,8], index: 2, kind: input, shape index: {}]   ;;  %s823_s3 = inlined_call_operand.vmem [shape: f32[2,32], index: 3, kind: input, shape index: {}]   ;;  %s824_s4 = inlined_call_operand.vmem [shape: f32[64,32], index: 4, kind: input, shape index: {}]   ;;  %s825_s5 = inlined_call_operand.hbm [shape: f32[1,8], index: 5, kind: output, shape index: {}]  }
   0x1   :  { %11 = vsyncpa [#allocation3], 0  ;;  %s18_s20 = sshll.u32 %s820_s0, 4  ;;  %s19_s20 = int_to_ptr.vmem [resolvable:$true] %s18_s20 }
   0x2   :  { %s603_s21 = scalar_lea.vmem %s19_s20, 16  ;;  %p608_p1 = scmp.lt.s32.totalorder %s19_s20, %s19_s20 }
   0x3   :  { %p604_p0 = scmp.ne.s32.totalorder %s19_s20, %s603_s21  ;;  %p609_p2 = scmp.lt.s32.totalorder %s603_s21, %s603_s21 }
   0x5   :  { %p610_p3 = por %p609_p2, %p608_p1 }
   0x7   :  { %p611_p4 = pnand %p610_p3, %p604_p0 }
   0x9   :  { %614 = shalt.err (!%p611_p4)
}
   0xa   :  { %s641_s22 = smov [#allocation2]  }
   0xb   :  { %21 = dma.vmem_to_smem %s19_s20, 16, %s641_s22, [#allocation4]  }
   0xc   :  { %637 = dma.done.wait [#allocation4], 16  }
   0xd   :  { %638 = vsyncadd [#allocation4], 4294967280 }
   0xe   :  { %33 = sfence }
   0xf   :  { %v683_v0 = vld [vmem:[%s821_s1] sm:$0xff]  ;;  %v688_v1 = vld [vmem:[%s821_s1 + $0x8] sm:$0xff]  ;;  %vm61_vm0 = vcmask 261120   ;;  %v642_v4 = vmov 0.0|0.0   ;;  %v707_v7 = vld [vmem:[%s821_s1 + $0x10] sm:$0xff]  ;;  %s461_s9 = sld [smem:[#allocation2 + $0x1]] }
  0x10   :  { %v693_v2 = vld [vmem:[%s822_s2] sm:$0xff]  ;;  %v565_v3 = vpack.c.bf16 %v688_v1, %v683_v0  ;;  %559 = vmatprep.subr.bf16.mxu0 %v642_v4  ;;  %v700_v5 = vld [vmem:[%s822_s2 + $0x8] sm:$0xff]  ;;  %v712_v8 = vld [vmem:[%s821_s1 + $0x18] sm:$0xff]  ;;  %vm643_vm1 = vmmov 0   ;;  %v644_v14 = vmov 0.0   ;;  %vm381_vm2 = vcmask 64512  }
  0x11   :  { %v57_v6 = vsub.f32 %v683_v0, %v693_v2  ;;  %v58_v9 = vsub.f32 %v688_v1, %v700_v5  ;;  %v569_v10 = vpack.c.bf16 %v712_v8, %v707_v7  ;;  %v721_v11 = vld [vmem:[%s822_s2 + $0x10] sm:$0xff]  ;;  %v726_v12 = vld [vmem:[%s822_s2 + $0x18] sm:$0xff]  ;;  %v48_v13 = vld [vmem:[%s824_s4] sm:$0xff]  ;;  %516 = vmatprep.mubr.msk.f32.mxu0 %vm643_vm1, %v644_v14  ;;  %v573_v19 = vpack.c.bf16 %v700_v5, %v693_v2  ;;  %s645_s2 = smov 0.001   ;;  %s646_s6 = smov [#allocation5]  }
  0x12   :  { %566 = vmatprep.subr.bf16.mxu1 %v565_v3  ;;  %v59_v15 = vsub.f32 %v707_v7, %v721_v11  ;;  %v60_v16 = vsub.f32 %v712_v8, %v726_v12  ;;  %527 = vmatprep.mubr.msk.f32.mxu1 %vm61_vm0, %v48_v13  ;;  %v49_v20 = vld [vmem:[%s824_s4 + $0x8] sm:$0xff]  ;;  %v50_v22 = vld [vmem:[%s824_s4 + $0x10] sm:$0xff]  ;;  %v56_v23 = vld [vmem:[%s823_s3] sm:$0x3]  ;;  %v577_v24 = vpack.c.bf16 %v726_v12, %v721_v11  ;;  %s452_s7 = sshll.u32 %s646_s6, 4  ;;  %vm444_vm3 = vcmask 57344   ;;  %s453_s7 = int_to_ptr.vmem [resolvable:$true] %s452_s7 }
  0x13   :  { %568 = vmatpush3.bf16.msra.mxu1 %v565_v3  ;;  %v560_v17 = vpack.c.bf16 %v58_v9, %v57_v6  ;;  %v51_v25 = vld [vmem:[%s824_s4 + $0x18] sm:$0xff]  ;;  %v52_v26 = vld [vmem:[%s824_s4 + $0x20] sm:$0xff]  ;;  %v53_v27 = vld [vmem:[%s824_s4 + $0x28] sm:$0xff]  ;;  %s615_s8 = scalar_lea.vmem %s453_s7, 16  ;;  %p620_p6 = scmp.lt.s32.totalorder %s453_s7, %s453_s7 }
  0x14   :  { %570 = vmatprep.subr.bf16.mxu1 %v569_v10  ;;  %v563_v18 = vpack.c.bf16 %v60_v16, %v59_v15  ;;  %v54_v28 = vld [vmem:[%s824_s4 + $0x30] sm:$0xff]  ;;  %v55_v30 = vld [vmem:[%s824_s4 + $0x38] sm:$0xff]  ;;  %s34_s4 = sld [smem:[#allocation2]]  ;;  %p616_p5 = scmp.ne.s32.totalorder %s453_s7, %s615_s8 }
  0x15   :  { %561 = vmatpush3.bf16.msra.mxu0 %v560_v17  ;;  %s36_s15 = smax.f32 %s645_s2, %s461_s9  ;;  %s619_s9 = scalar_lea.vmem %s453_s7, 32 }
  0x16   :  { %562 = vmatprep.subr.bf16.mxu0 %v642_v4  ;;  %v37_v21 = vstv %s36_s15  ;;  %p621_p7 = scmp.lt.s32.totalorder %s619_s9, %s615_s8 }
  0x17   :  { %572 = vmatpush3.bf16.msra.mxu1 %v569_v10  ;;  %593 = vrcp.f32 %v37_v21 }
  0x18   :  { %581 = vmatprep.subr.bf16.mxu1 %v573_v19  ;;  %p622_p8 = por %p621_p7, %p620_p6 }
  0x19   :  { %564 = vmatpush3.bf16.msra.mxu0 %v563_v18 }
  0x1a   :  { %528 = vmatmul.mubr.msk.f32.vlgmr.msra.gmra.mrb[0].mxu1 %vm61_vm0, %v49_v20  ;;  %574 = vmatprep.subr.bf16.mxu0 %v573_v19  ;;  %p623_p9 = pnand %p622_p8, %p616_p5 }
  0x1b   :  { %530 = vmatprep.mubr.msk.f32.mxu1 %vm61_vm0, %v50_v22  ;;  %583 = vmatpush3.bf16.msra.mxu1 %v573_v19 }
  0x1c   :  { %517 = vmatmul.mubr.msk.f32.vlgmr.msra.gmra.mrb[0].mxu0 %vm61_vm0, %v56_v23  ;;  %582 = vmatprep.subr.bf16.mxu1 %v577_v24 }
  0x1d   :  { %576 = vmatpush3.bf16.msra.mxu0 %v573_v19  ;;  %547 = vmatprep.mubr.msk.f32.mxu0 %vm61_vm0, %v48_v13 }
  0x1e   :  { %531 = vmatmul.mubr.msk.f32.gmra.mrb[2].mxu1 %vm61_vm0, %v51_v25  ;;  %578 = vmatprep.subr.bf16.mxu0 %v577_v24 }
  0x1f   :  { %533 = vmatprep.mubr.msk.f32.mxu1 %vm61_vm0, %v52_v26  ;;  %584 = vmatpush3.bf16.msra.mxu1 %v577_v24 }
  0x21   :  { %580 = vmatpush3.bf16.msra.mxu0 %v577_v24  ;;  %v594_v29 = vpop.eup %593 }
  0x22   :  { %534 = vmatmul.mubr.msk.f32.gmra.mrb[4].mxu1 %vm61_vm0, %v53_v27  ;;  %585 = vpush %v594_v29 }
  0x23   :  { %536 = vmatprep.mubr.msk.f32.mxu1 %vm61_vm0, %v54_v28 }
  0x24   :  { %548 = vmatmul.mubr.msk.f32.vlgmr.msra.gmra.mrb[2].mxu0 %vm61_vm0, %v49_v20 }
  0x25   :  { %550 = vmatprep.mubr.msk.f32.mxu0 %vm61_vm0, %v50_v22 }
  0x26   :  { %537 = vmatmul.mubr.msk.f32.gmra.mrb[6].mxu1 %vm61_vm0, %v55_v30 }
  0x27   :  { %556 = vmatprep.mubr.msk.f32.mxu1 %vm61_vm0, %v54_v28 }
  0x28   :  { %551 = vmatmul.mubr.msk.f32.gmra.mrb[4].mxu0 %vm61_vm0, %v51_v25 }
  0x29   :  { %553 = vmatprep.mubr.msk.f32.mxu0 %vm61_vm0, %v52_v26 }
  0x2a   :  { %557 = vmatmul.mubr.msk.f32.vlgmr.msra.gmra.mrb[8].mxu1 %vm61_vm0, %v55_v30  ;;  %v420_v30 = vstv %s34_s4 }
  0x2c   :  { %554 = vmatmul.mubr.msk.f32.gmra.mrb[6].mxu0 %vm61_vm0, %v53_v27 }
  0x53   :  { %s586_s30 = spop %585 }
  0xed   :  { %v529_v31 = vpop.f32.mrb[0].mxu1 }
  0xee   :  { %v225_v32 = vpop.f32.mrb[1].mxu1  ;;  %v370_v40 = vmul.f32 %v529_v31, %v688_v1 }
  0xef   :  { %v780_v33 = vpop.f32.mrb[0].mxu0  ;;  %v369_v43 = vmul.f32 %v225_v32, %v683_v0 }
  0xf0   :  { %v518_v34 = vpop.f32.mrb[1].mxu0 }
  0xf1   :  { %v532_v35 = vpop.f32.mrb[2].mxu1 }
  0xf2   :  { %v235_v36 = vpop.f32.mrb[3].mxu1  ;;  %v372_v50 = vmul.f32 %v532_v35, %v712_v8 }
  0xf3   :  { %v371_v55 = vmul.f32 %v235_v36, %v707_v7  ;;  %v425_v36 = vstv %s586_s30 }
  0xf5   :  { %v535_v37 = vpop.f32.mrb[4].mxu1 }
  0xf6   :  { %v245_v38 = vpop.f32.mrb[5].mxu1 }
  0xf7   :  { %v549_v39 = vpop.f32.mrb[2].mxu0  ;;  %v395_v14 = vmul.f32 %v245_v38, %v683_v0 }
  0xf8   :  { %v374_v41 = vmul.f32 %v549_v39, %v700_v5  ;;  %v330_v42 = vpop.f32.mrb[3].mxu0 }
  0xf9   :  { %v373_v44 = vmul.f32 %v330_v42, %v693_v2  ;;  %v538_v45 = vpop.f32.mrb[6].mxu1 }
  0xfa   :  { %v378_v46 = vsub.f32 %v370_v40, %v374_v41  ;;  %v255_v47 = vpop.f32.mrb[7].mxu1  ;;  %v398_v53 = vmul.f32 %v538_v45, %v712_v8  ;;  %v396_v8 = vmul.f32 %v535_v37, %v688_v1 }
  0xfb   :  { %v377_v48 = vsub.f32 %v369_v43, %v373_v44  ;;  %v552_v49 = vpop.f32.mrb[4].mxu0  ;;  %v397_v3 = vmul.f32 %v255_v47, %v707_v7 }
  0xfc   :  { %v383_v51 = vsel %vm381_vm2, %v378_v46, 0.0  ;;  %v376_v52 = vmul.f32 %v552_v49, %v726_v12  ;;  %v340_v54 = vpop.f32.mrb[5].mxu0 }
  0xfd   :  { %v382_v56 = vsel %vm381_vm2, %v377_v48, 0.0  ;;  %v375_v57 = vmul.f32 %v340_v54, %v721_v11  ;;  %v558_v58 = vpop.f32.mrb[8].mxu1 }
  0xfe   :  { %v384_v59 = vadd.f32 %v383_v51, %v382_v56  ;;  %v380_v60 = vsub.f32 %v372_v50, %v376_v52  ;;  %v402_v61 = vmul.f32 %v558_v58, %v726_v12  ;;  %v360_v62 = vpop.f32.mrb[9].mxu1 }
  0xff   :  { %v379_v63 = vsub.f32 %v371_v55, %v375_v57  ;;  %v555_v4 = vpop.f32.mrb[6].mxu0  ;;  %v401_v6 = vmul.f32 %v360_v62, %v721_v11 }
 0x100   :  { %v406_v9 = vsub.f32 %v398_v53, %v402_v61  ;;  %v400_v10 = vmul.f32 %v555_v4, %v700_v5  ;;  %v350_v13 = vpop.f32.mrb[7].mxu0  ;;  %v387_v7 = vsel %vm381_vm2, %v380_v60, 0.0 }
 0x101   :  { %v385_v15 = vsel %vm381_vm2, %v379_v63, 0.0  ;;  %v405_v16 = vsub.f32 %v397_v3, %v401_v6  ;;  %v399_v12 = vmul.f32 %v350_v13, %v693_v2 }
 0x102   :  { %v386_v17 = vadd.f32 %v385_v15, %v384_v59  ;;  %v404_v18 = vsub.f32 %v396_v8, %v400_v10  ;;  %v412_v24 = vsel %vm381_vm2, %v406_v9, 0.0 }
 0x103   :  { %v403_v19 = vsub.f32 %v395_v14, %v399_v12  ;;  %v410_v22 = vsel %vm381_vm2, %v405_v16, 0.0 }
 0x104   :  { %v388_v20 = vadd.f32 %v387_v7, %v386_v17  ;;  %v408_v11 = vsel %vm381_vm2, %v404_v18, 0.0 }
 0x105   :  { %v407_v1 = vsel %vm381_vm2, %v403_v19, 0.0 }
 0x106   :  { %v389_v21 = vrot.slane %v388_v20, 4  ;;  %v409_v5 = vadd.f32 %v408_v11, %v407_v1 }
 0x108   :  { %v390_v0 = vadd.f32 %v389_v21, %v388_v20  ;;  %v411_v23 = vadd.f32 %v410_v22, %v409_v5 }
 0x10a   :  { %v413_v2 = vadd.f32 %v412_v24, %v411_v23  ;;  %v391_v25 = vrot.slane %v390_v0, 2 }
 0x10c   :  { %v414_v26 = vrot.slane %v413_v2, 4  ;;  %v392_v27 = vadd.f32 %v391_v25, %v390_v0 }
 0x10e   :  { %v393_v28 = vrot.slane %v392_v27, 1  ;;  %v415_v29 = vadd.f32 %v414_v26, %v413_v2 }
 0x110   :  { %v394_v31 = vadd.f32 %v393_v28, %v392_v27  ;;  %v416_v32 = vrot.slane %v415_v29, 2 }
 0x112   :  { %v417_v34 = vadd.f32 %v416_v32, %v415_v29  ;;  %v421_v35 = vmul.f32 %v420_v30, %v394_v31 }
 0x114   :  { %v418_v37 = vrot.slane %v417_v34, 1  ;;  %v422_v38 = vadd.f32 %v421_v35, %v780_v33 }
 0x116   :  { %v419_v39 = vadd.f32 %v418_v37, %v417_v34  ;;  %v426_v40 = vmul.f32 %v425_v36, %v422_v38 }
 0x118   :  { %v423_v41 = vmul.f32 %v420_v30, %v419_v39  ;;  %v427_v42 = vsub.f32 0.0, %v426_v40 }
 0x11a   :  { %v424_v43 = vadd.f32 %v423_v41, %v780_v33  ;;  %v428_v44 = vmul.f32 1.442695, %v427_v42 }
 0x11c   :  { %v433_v45 = vmul.f32 %v425_v36, %v424_v43  ;;  %595 = vpow2.f32 %v428_v44 }
 0x11e   :  { %v434_v46 = vsub.f32 0.0, %v433_v45 }
 0x120   :  { %v435_v47 = vmul.f32 1.442695, %v434_v46 }
 0x122   :  { %597 = vpow2.f32 %v435_v47 }
 0x126   :  { %v596_v48 = vpop.eup %595 }
 0x127   :  { %v430_v50 = vadd.f32 1.0, %v596_v48 }
 0x12c   :  { %v598_v49 = vpop.eup %597 }
 0x12d   :  { %v437_v51 = vadd.f32 1.0, %v598_v49 }
 0x12f   :  { %599 = vrcp.f32 %v437_v51 }
 0x130   :  { %601 = vrcp.f32 %v430_v50 }
 0x139   :  { %v600_v52 = vpop.eup %599 }
 0x13a   :  { %v441_v53 = vrot.slane %v600_v52, 1  ;;  %v602_v54 = vpop.eup %601 }
 0x13c   :  { %v443_v55 = vmul.f32 %v602_v54, %v441_v53 }
 0x13e   :  { %445 = vst.msk [vmem:[#allocation5] sm:$0x1] %vm444_vm3, %v443_v55 }
 0x13f   :  { %626 = shalt.err (!%p623_p9)
}
 0x140   :  { %s627_s12 = scalar_lea.hbm %s825_s5, 16 }
 0x141   :  { %p628_p10 = scmp.ne.s32.totalorder %s825_s5, %s627_s12  ;;  %p631_p11 = scmp.lt.u32.totalorder %s627_s12, %s825_s5 }
 0x143   :  { %p633_p12 = pnand %p631_p11, %p628_p10 }
 0x145   :  { %636 = shalt.err (!%p633_p12)
}
 0x146   :  { %455 = dma.vmem_to_hbm [thread:$0]  %s453_s7, 16, %s825_s5, [#allocation3]  }
 0x147   :  { %639 = dma.done.wait [#allocation3], 16  }
 0x148   :  { %640 = vsyncadd [#allocation3], 4294967280 }
 0x149   :  { %459 = vsyncpa [#allocation3], 1 }
 0x14a   :  { %460 = vsyncpa [#allocation4], 1 }

</bundles_post_ra>
